<compile_context>
chip_gen: v6e
topology: v6e:2x2x1
jax: 0.10.0
libtpu: 0.0.40
codegen_flags: <defaults>
</compile_context>

<pallas_src>
import math

import jax
import jax.numpy as jnp
from jax import lax
from jax.experimental import pallas as pl
from jax.experimental.pallas import tpu as pltpu

# ------------------------- model sizes (small, synthetic) -------------------
BATCH = 4
SEQ_T = 8              # timesteps processed per kernel launch
HIDDEN = 32            # hidden_size
MEMORY = 32            # memory_size
VOCAB = 16             # vocab_size
FEAT = 256             # physical / utterance feature width (hardcoded 256)
G2 = HIDDEN // 2       # goal-embedding bottleneck width (16)
GRU_IN = HIDDEN + 2 * FEAT   # 544 (original concat width; host-side only)

_LOG_SQRT_2PI = 0.5 * math.log(2.0 * math.pi)

# ---- packed GRU weight slab (bf16, (GW_ROWS, 128); lanes 0:96 used) ---------
GW_G, GW_P, GW_H = 0, 16, 528          # goal16 | phys+utt 512 | hidden 32
GW_ROWS = 560
GW_LANES = 128

# ---- packed bf16 small-weight slab (rows 16-aligned for bf16 tiling) --------
RW_GEW1, RW_FWF, RW_FW2 = 0, 16, 48
WS_ROWS = 144

# ---- packed f32 bias slab (each bias replicated over 8 rows) ----------------
RB_GEB1, RB_BIH, RB_BHHN, RB_FBF, RB_FB2 = 0, 8, 16, 24, 32
BIAS_ROWS = 40
BIAS_REP = 8

HEAD2_W = 8 + VOCAB          # 24 = [vel_mean|vel_ls|gaz_mean|gaz_ls|logits]

# ---- packed per-step activation slab (f32, lanes) ---------------------------
A_GOAL, A_VEPS, A_GEPS, A_GUM = 0, 4, 6, 8
AUX_W = 128

# ---- packed output layout (f32, (T, B, 128)) --------------------------------
O_VEL, O_VLP, O_GAZ, O_GLP, O_UTT = 0, 2, 4, 6, 8
O_MEM = O_UTT + VOCAB        # 24
OUT_W = 128


def _leaky(x):
    return jnp.where(x > 0, x, 0.01 * x)


def _bdot(x, w):
    return jnp.dot(x.astype(jnp.bfloat16), w, preferred_element_type=jnp.float32)


# ------------------------------ Pallas kernel --------------------------------
def action_processor_kernel(mem_ref, aux_ref, pu_ref, gw_ref, ws_ref, b_ref,
                            out_ref, state_ref):
    t = pl.program_id(0)
    B = mem_ref.shape[0]
    M = MEMORY

    # initialize the recurrent state from the `memory` input on the first step
    @pl.when(t == 0)
    def _():
        state_ref[...] = mem_ref[...]

    aux = aux_ref[...]                         # (B, 128) f32, streamed per step
    goal = aux[:, A_GOAL:A_GOAL + 4]
    vel_eps = aux[:, A_VEPS:A_VEPS + 2]
    gaz_eps = aux[:, A_GEPS:A_GEPS + 2]
    gumbel = aux[:, A_GUM:A_GUM + VOCAB]

    # bf16 weight slab (VMEM-resident across all steps; constant index_map)
    ge_w1 = ws_ref[RW_GEW1:RW_GEW1 + 4, 0:G2]
    f_wf = ws_ref[RW_FWF:RW_FWF + MEMORY, 0:3 * HIDDEN]
    f_w2 = ws_ref[RW_FW2:RW_FW2 + 3 * HIDDEN, 0:HEAD2_W]

    # f32 biases, pre-replicated rows -> plain full-tile VPU adds
    ge_b1 = b_ref[RB_GEB1:RB_GEB1 + B, 0:G2]
    b_ih = b_ref[RB_BIH:RB_BIH + B, :]                 # (B,128); lanes 96:128 zero
    b_hhn = b_ref[RB_BHHN:RB_BHHN + B, 0:M]
    f_bf = b_ref[RB_FBF:RB_FBF + B, 0:3 * HIDDEN]
    f_b2 = b_ref[RB_FB2:RB_FB2 + B, 0:HEAD2_W]

    # goal embedding stage 1 (stage 2 folded into the GRU input weights)
    g2 = _leaky(_bdot(goal, ge_w1) + ge_b1)

    # GRU input/hidden contractions (lane-dense 128-wide bf16 slabs, f32 acc)
    h = state_ref[...]
    gi = (_bdot(g2, gw_ref[GW_G:GW_P, :])
          + _bdot(pu_ref[...], gw_ref[GW_P:GW_H, :])
          + b_ih)
    gh = _bdot(h, gw_ref[GW_H:GW_ROWS, :])

    # torch.nn.GRUCell gate order: r, z, n  (r/z hidden biases folded into b_ih)
    r = jax.nn.sigmoid(gi[:, 0:M] + gh[:, 0:M])
    z = jax.nn.sigmoid(gi[:, M:2 * M] + gh[:, M:2 * M])
    n = jnp.tanh(gi[:, 2 * M:3 * M] + r * (gh[:, 2 * M:3 * M] + b_hhn))
    new_mem = (1.0 - z) * n + z * h
    state_ref[...] = new_mem

    # fused heads: one (B,32)@(32,96) + LeakyReLU, one block-diag (B,96)@(96,24)
    h_all = _leaky(_bdot(new_mem, f_wf) + f_bf)
    out2 = _bdot(h_all, f_w2) + f_b2

    vel_mean, vel_ls = out2[:, 0:2], out2[:, 2:4]
    gaz_mean, gaz_ls = out2[:, 4:6], out2[:, 6:8]
    logits = out2[:, 8:8 + VOCAB]

    # reparameterized Gaussian samples; log_prob via eps (no division by std)
    vel = vel_mean + jnp.exp(vel_ls) * vel_eps
    vel_lp = -0.5 * vel_eps * vel_eps - vel_ls - _LOG_SQRT_2PI
    gaz = gaz_mean + jnp.exp(gaz_ls) * gaz_eps
    gaz_lp = -0.5 * gaz_eps * gaz_eps - gaz_ls - _LOG_SQRT_2PI

    # hard gumbel-softmax (tau=1, forward pass): one-hot at argmax(logits + g)
    # TODO(synk): straight-through gradient path not implemented (forward only).
    pert = logits + gumbel
    mx = jnp.max(pert, axis=-1, keepdims=True)
    idx = lax.broadcasted_iota(jnp.int32, pert.shape, 1)
    first = jnp.min(jnp.where(pert >= mx, idx, VOCAB), axis=-1, keepdims=True)
    onehot = (idx == first).astype(jnp.float32)

    # direct sliced stores into one lane-dense (B,128) output tile (no concat)
    out_ref[:, O_VEL:O_VEL + 2] = vel
    out_ref[:, O_VLP:O_VLP + 2] = vel_lp
    out_ref[:, O_GAZ:O_GAZ + 2] = gaz
    out_ref[:, O_GLP:O_GLP + 2] = gaz_lp
    out_ref[:, O_UTT:O_UTT + VOCAB] = onehot
    out_ref[:, O_MEM:O_MEM + MEMORY] = new_mem


# -------------------------------- wrapper ------------------------------------
@jax.jit
def action_processor_seq(memory0, aux, physutt, gru_w, wsmall, bias):
    """Runs T GRU steps inside one kernel launch. Returns per-step outputs."""
    T, B = aux.shape[0], aux.shape[1]
    packed = pl.pallas_call(
        action_processor_kernel,
        out_shape=jax.ShapeDtypeStruct((T, B, OUT_W), jnp.float32),
        grid_spec=pltpu.PrefetchScalarGridSpec(
            num_scalar_prefetch=0,
            grid=(T,),
            in_specs=[
                pl.BlockSpec((B, MEMORY), lambda t: (0, 0)),        # resident
                pl.BlockSpec((None, B, AUX_W), lambda t: (t, 0, 0)),    # stream
                pl.BlockSpec((None, B, 2 * FEAT), lambda t: (t, 0, 0)),  # stream
                pl.BlockSpec((GW_ROWS, GW_LANES), lambda t: (0, 0)),  # resident
                pl.BlockSpec((WS_ROWS, 128), lambda t: (0, 0)),       # resident
                pl.BlockSpec((BIAS_ROWS, 128), lambda t: (0, 0)),     # resident
            ],
            out_specs=pl.BlockSpec((None, B, OUT_W), lambda t: (t, 0, 0)),
            scratch_shapes=[pltpu.VMEM((B, MEMORY), jnp.float32)]),
        compiler_params=pltpu.CompilerParams(
            dimension_semantics=("arbitrary",)),
    )(memory0, aux, physutt, gru_w, wsmall, bias)

    velocity = packed[:, :, O_VEL:O_VEL + 2]
    velocity_lp = packed[:, :, O_VLP:O_VLP + 2]
    gaze = packed[:, :, O_GAZ:O_GAZ + 2]
    gaze_lp = packed[:, :, O_GLP:O_GLP + 2]
    utterance = packed[:, :, O_UTT:O_UTT + VOCAB]
    new_memory = packed[:, :, O_MEM:O_MEM + MEMORY]
    return velocity, velocity_lp, gaze, gaze_lp, utterance, new_memory


# --------------------------- deterministic params ----------------------------
def _uniform(key, shape, fan_in):
    bound = 1.0 / math.sqrt(fan_in)
    return jax.random.uniform(key, shape, jnp.float32, -bound, bound)


def make_params(key):
    """Original (unfused) parameters mirroring the PyTorch module layout.

    Weights stored as (in_features, out_features); biases as (1, out)."""
    keys = iter(jax.random.split(key, 64))

    def lin(in_f, out_f):
        w = _uniform(next(keys), (in_f, out_f), in_f)
        b = _uniform(next(keys), (1, out_f), in_f)
        return w, b

    p = {}
    p["ge_w1"], p["ge_b1"] = lin(4, G2)
    p["ge_w2"], p["ge_b2"] = lin(G2, HIDDEN)
    p["gru_wih"] = _uniform(next(keys), (GRU_IN, 3 * MEMORY), MEMORY)
    p["gru_whh"] = _uniform(next(keys), (MEMORY, 3 * MEMORY), MEMORY)
    p["gru_bih"] = _uniform(next(keys), (1, 3 * MEMORY), MEMORY)
    p["gru_bhh"] = _uniform(next(keys), (1, 3 * MEMORY), MEMORY)
    p["vel_wf"], p["vel_bf"] = lin(MEMORY, HIDDEN)
    p["vel_wm"], p["vel_bm"] = lin(HIDDEN, 2)
    p["vel_ws"], p["vel_bs"] = lin(HIDDEN, 2)
    p["gaz_wf"], p["gaz_bf"] = lin(MEMORY, HIDDEN)
    p["gaz_wm"], p["gaz_bm"] = lin(HIDDEN, 2)
    p["gaz_ws"], p["gaz_bs"] = lin(HIDDEN, 2)
    p["utd_w1"], p["utd_b1"] = lin(MEMORY, HIDDEN)
    p["utd_w2"], p["utd_b2"] = lin(HIDDEN, VOCAB)
    return p


def pack_params(p):
    """Fold/fuse/pack the original parameters into the three kernel slabs."""
    w_ih_g = p["gru_wih"][:HIDDEN, :]               # (32, 96)
    w_ih_p = p["gru_wih"][HIDDEN:HIDDEN + FEAT, :]  # (256, 96)
    w_ih_u = p["gru_wih"][HIDDEN + FEAT:, :]        # (256, 96)

    # fold goal-embedding 2nd Linear into the GRU input weights / bias
    w_g_fold = p["ge_w2"] @ w_ih_g                          # (16, 96)
    b_ih_fold = p["gru_bih"] + p["ge_b2"] @ w_ih_g          # (1, 96)
    # fold hidden bias for the r/z gates into b_ih; keep only n-gate part
    b_ih_fold = b_ih_fold.at[:, 0:2 * MEMORY].add(p["gru_bhh"][:, 0:2 * MEMORY])
    b_hh_n = p["gru_bhh"][:, 2 * MEMORY:3 * MEMORY]

    # GRU weight slab: bf16, lane-padded to 128
    gru_w = jnp.zeros((GW_ROWS, GW_LANES), jnp.float32)
    gru_w = gru_w.at[GW_G:GW_P, 0:3 * MEMORY].set(w_g_fold)
    gru_w = gru_w.at[GW_P:GW_P + FEAT, 0:3 * MEMORY].set(w_ih_p)
    gru_w = gru_w.at[GW_P + FEAT:GW_H, 0:3 * MEMORY].set(w_ih_u)
    gru_w = gru_w.at[GW_H:GW_ROWS, 0:3 * MEMORY].set(p["gru_whh"])
    gru_w = gru_w.astype(jnp.bfloat16)

    # fuse the three post-GRU first-layer heads: new_mem -> [vel_h|gaz_h|utt_h]
    f_wf = jnp.concatenate([p["vel_wf"], p["gaz_wf"], p["utd_w1"]], axis=1)
    f_bf = jnp.concatenate([p["vel_bf"], p["gaz_bf"], p["utd_b1"]], axis=1)

    # block-diagonal second stage (96, 24): [vel_mean|vel_ls|gaz_mean|gaz_ls|logits]
    z2 = jnp.zeros((HIDDEN, 2), jnp.float32)
    zv = jnp.zeros((HIDDEN, VOCAB), jnp.float32)
    f_w2 = jnp.concatenate([
        jnp.concatenate([p["vel_wm"], p["vel_ws"], z2, z2, zv], axis=1),
        jnp.concatenate([z2, z2, p["gaz_wm"], p["gaz_ws"], zv], axis=1),
        jnp.concatenate([z2, z2, z2, z2, p["utd_w2"]], axis=1)], axis=0)
    f_b2 = jnp.concatenate(
        [p["vel_bm"], p["vel_bs"], p["gaz_bm"], p["gaz_bs"], p["utd_b2"]],
        axis=1)

    # bf16 small-weight slab
    wsmall = jnp.zeros((WS_ROWS, 128), jnp.float32)
    wsmall = wsmall.at[RW_GEW1:RW_GEW1 + 4, 0:G2].set(p["ge_w1"])
    wsmall = wsmall.at[RW_FWF:RW_FWF + MEMORY, 0:3 * HIDDEN].set(f_wf)
    wsmall = wsmall.at[RW_FW2:RW_FW2 + 3 * HIDDEN, 0:HEAD2_W].set(f_w2)
    wsmall = wsmall.astype(jnp.bfloat16)

    # f32 bias slab, each bias replicated over 8 rows (no sublane broadcast)
    rep = lambda v: jnp.tile(v, (BIAS_REP, 1))
    bias = jnp.zeros((BIAS_ROWS, 128), jnp.float32)
    bias = bias.at[RB_GEB1:RB_GEB1 + BIAS_REP, 0:G2].set(rep(p["ge_b1"]))
    bias = bias.at[RB_BIH:RB_BIH + BIAS_REP, 0:3 * MEMORY].set(rep(b_ih_fold))
    bias = bias.at[RB_BHHN:RB_BHHN + BIAS_REP, 0:MEMORY].set(rep(b_hh_n))
    bias = bias.at[RB_FBF:RB_FBF + BIAS_REP, 0:3 * HIDDEN].set(rep(f_bf))
    bias = bias.at[RB_FB2:RB_FB2 + BIAS_REP, 0:HEAD2_W].set(rep(f_b2))
    return gru_w, wsmall, bias


def pack_step_inputs(goal, phys, utt, vel_eps, gaz_eps, gumbel):
    """Pack per-step activations into two lane-dense slabs (fewer DMAs)."""
    T, B = goal.shape[0], goal.shape[1]
    aux = jnp.zeros((T, B, AUX_W), jnp.float32)
    aux = aux.at[:, :, A_GOAL:A_GOAL + 4].set(goal)
    aux = aux.at[:, :, A_VEPS:A_VEPS + 2].set(vel_eps)
    aux = aux.at[:, :, A_GEPS:A_GEPS + 2].set(gaz_eps)
    aux = aux.at[:, :, A_GUM:A_GUM + VOCAB].set(gumbel)
    physutt = jnp.concatenate([phys, utt], axis=-1).astype(jnp.bfloat16)
    return aux, physutt


# ---------------------- plain-JAX mirror (sanity check) ----------------------
def reference_seq(memory0, aux, physutt, gru_w, wsmall, bias):
    leaky = lambda x: jnp.where(x > 0, x, 0.01 * x)
    bdot = lambda x, w: jnp.dot(x.astype(jnp.bfloat16), w,
                                preferred_element_type=jnp.float32)
    T = aux.shape[0]
    M = MEMORY
    ge_w1 = wsmall[RW_GEW1:RW_GEW1 + 4, 0:G2]
    f_wf = wsmall[RW_FWF:RW_FWF + MEMORY, 0:3 * HIDDEN]
    f_w2 = wsmall[RW_FW2:RW_FW2 + 3 * HIDDEN, 0:HEAD2_W]
    ge_b1 = bias[RB_GEB1:RB_GEB1 + 1, 0:G2]
    b_ih = bias[RB_BIH:RB_BIH + 1, 0:3 * M]
    b_hhn = bias[RB_BHHN:RB_BHHN + 1, 0:M]
    f_bf = bias[RB_FBF:RB_FBF + 1, 0:3 * HIDDEN]
    f_b2 = bias[RB_FB2:RB_FB2 + 1, 0:HEAD2_W]

    h = memory0
    vels, vlps, gazs, glps, mems = [], [], [], [], []
    for t in range(T):
        goal = aux[t, :, A_GOAL:A_GOAL + 4]
        vel_eps = aux[t, :, A_VEPS:A_VEPS + 2]
        gaz_eps = aux[t, :, A_GEPS:A_GEPS + 2]
        pu = physutt[t]
        g2 = leaky(bdot(goal, ge_w1) + ge_b1)
        gi = (bdot(g2, gru_w[GW_G:GW_P, 0:3 * M])
              + bdot(pu, gru_w[GW_P:GW_H, 0:3 * M]) + b_ih)
        gh = bdot(h, gru_w[GW_H:GW_ROWS, 0:3 * M])
        r = jax.nn.sigmoid(gi[:, :M] + gh[:, :M])
        z = jax.nn.sigmoid(gi[:, M:2 * M] + gh[:, M:2 * M])
        n = jnp.tanh(gi[:, 2 * M:] + r * (gh[:, 2 * M:] + b_hhn))
        h = (1.0 - z) * n + z * h
        h_all = leaky(bdot(h, f_wf) + f_bf)
        out2 = bdot(h_all, f_w2) + f_b2
        vel = out2[:, 0:2] + jnp.exp(out2[:, 2:4]) * vel_eps
        vlp = -0.5 * vel_eps ** 2 - out2[:, 2:4] - _LOG_SQRT_2PI
        gaz = out2[:, 4:6] + jnp.exp(out2[:, 6:8]) * gaz_eps
        glp = -0.5 * gaz_eps ** 2 - out2[:, 6:8] - _LOG_SQRT_2PI
        vels.append(vel); vlps.append(vlp); gazs.append(gaz); glps.append(glp)
        mems.append(h)
    st = lambda xs: jnp.stack(xs, axis=0)
    return st(vels), st(vlps), st(gazs), st(glps), st(mems)


# ----------------------------------- main ------------------------------------
if __name__ == "__main__":
    assert BATCH <= BIAS_REP  # bias slab stores 8 replicated rows per bias

    key = jax.random.PRNGKey(0)
    ks = jax.random.split(key, 9)

    goal = jax.random.normal(ks[0], (SEQ_T, BATCH, 4), jnp.float32)
    memory0 = jax.random.normal(ks[1], (BATCH, MEMORY), jnp.float32)
    phys = jax.random.normal(ks[2], (SEQ_T, BATCH, FEAT), jnp.float32)
    uttf = jax.random.normal(ks[3], (SEQ_T, BATCH, FEAT), jnp.float32)
    vel_eps = jax.random.normal(ks[4], (SEQ_T, BATCH, 2), jnp.float32)
    gaz_eps = jax.random.normal(ks[5], (SEQ_T, BATCH, 2), jnp.float32)
    u = jax.random.uniform(ks[6], (SEQ_T, BATCH, VOCAB), jnp.float32, 1e-10, 1.0)
    gumbel = -jnp.log(-jnp.log(u))

    params = make_params(ks[7])
    gru_w, wsmall, bias = pack_params(params)
    aux, physutt = pack_step_inputs(goal, phys, uttf, vel_eps, gaz_eps, gumbel)

    outs = action_processor_seq(memory0, aux, physutt, gru_w, wsmall, bias)
    outs = jax.block_until_ready(outs)
    velocity, velocity_lp, gaze, gaze_lp, utterance, new_memory = outs

    # structural checks
    assert velocity.shape == (SEQ_T, BATCH, 2)
    assert velocity_lp.shape == (SEQ_T, BATCH, 2)
    assert gaze.shape == (SEQ_T, BATCH, 2)
    assert gaze_lp.shape == (SEQ_T, BATCH, 2)
    assert utterance.shape == (SEQ_T, BATCH, VOCAB)
    assert new_memory.shape == (SEQ_T, BATCH, MEMORY)
    assert bool(jnp.all(jnp.sum(utterance, axis=-1) == 1.0))
    assert bool(jnp.all(jnp.max(utterance, axis=-1) == 1.0))

    # numerical check against the plain-JAX mirror of the packed computation
    r_vel, r_vlp, r_gaz, r_glp, r_mem = reference_seq(
        memory0, aux, physutt, gru_w, wsmall, bias)
    for got, want in [(velocity, r_vel), (velocity_lp, r_vlp), (gaze, r_gaz),
                      (gaze_lp, r_glp), (new_memory, r_mem)]:
        assert bool(jnp.allclose(got, want, atol=2e-2, rtol=2e-2))

    print("KERNEL_OK")
</pallas_src>

<mosaic_0001>
module attributes {stable_mosaic.version = 11 : i64} {
  func.func @action_processor_kernel(%arg0: i32, %arg1: memref<4x32xf32, #tpu.memory_space<vmem>>, %arg2: memref<1x4x128xf32, #tpu.memory_space<vmem>>, %arg3: memref<1x4x512xbf16, #tpu.memory_space<vmem>>, %arg4: memref<560x128xbf16, #tpu.memory_space<vmem>>, %arg5: memref<144x128xbf16, #tpu.memory_space<vmem>>, %arg6: memref<40x128xf32, #tpu.memory_space<vmem>>, %arg7: memref<1x4x128xf32, #tpu.memory_space<vmem>>, %arg8: memref<4x32xf32, #tpu.memory_space<vmem>>) attributes {dimension_semantics = [#tpu.dimension_semantics<arbitrary>], iteration_bounds = array<i64: 8>, scalar_prefetch = 0 : i64, scratch_operands = 1 : i64, tpu.core_type = #tpu.core_type<tc>, window_params = [{pipeline_mode = #tpu.pipeline_mode<synchronous>, transform_indices = @transform_0, window_bounds = array<i64: 4, 32>}, {transform_indices = @transform_1, window_bounds = array<i64: 1, 4, 128>}, {transform_indices = @transform_2, window_bounds = array<i64: 1, 4, 512>}, {pipeline_mode = #tpu.pipeline_mode<synchronous>, transform_indices = @transform_3, window_bounds = array<i64: 560, 128>}, {pipeline_mode = #tpu.pipeline_mode<synchronous>, transform_indices = @transform_4, window_bounds = array<i64: 144, 128>}, {pipeline_mode = #tpu.pipeline_mode<synchronous>, transform_indices = @transform_5, window_bounds = array<i64: 40, 128>}, {transform_indices = @transform_6, window_bounds = array<i64: 1, 4, 128>}]} {
    %c0_i32 = arith.constant 0 : i32
    %0 = arith.cmpi eq, %arg0, %c0_i32 : i32
    %1 = arith.extui %0 : i1 to i32
    %c0_i32_0 = arith.constant 0 : i32
    %2 = arith.cmpi ne, %1, %c0_i32_0 : i32
    scf.if %2 {
      %c0_59 = arith.constant 0 : index
      %c0_60 = arith.constant 0 : index
      %132 = vector.load %arg1[%c0_59, %c0_60] : memref<4x32xf32, #tpu.memory_space<vmem>>, vector<4x32xf32>
      %c0_61 = arith.constant 0 : index
      %c0_62 = arith.constant 0 : index
      %133 = vector.load %arg8[%c0_61, %c0_62] : memref<4x32xf32, #tpu.memory_space<vmem>>, vector<4x32xf32>
      tpu.vector_store %arg8[%c0_61, %c0_62], %132 {strides = array<i32>} : memref<4x32xf32, #tpu.memory_space<vmem>>, vector<4x32xf32>,
    } else {
    }
    %c0 = arith.constant 0 : index
    %c0_1 = arith.constant 0 : index
    %c0_2 = arith.constant 0 : index
    %3 = vector.load %arg2[%c0, %c0_1, %c0_2] : memref<1x4x128xf32, #tpu.memory_space<vmem>>, vector<1x4x128xf32>
    %4 = vector.shape_cast %3 : vector<1x4x128xf32> to vector<4x128xf32>
    %5 = vector.extract_strided_slice %4 {offsets = [0, 0], sizes = [4, 4], strides = [1, 1]} : vector<4x128xf32> to vector<4x4xf32>
    %6 = vector.extract_strided_slice %4 {offsets = [0, 4], sizes = [4, 2], strides = [1, 1]} : vector<4x128xf32> to vector<4x2xf32>
    %7 = vector.extract_strided_slice %4 {offsets = [0, 6], sizes = [4, 2], strides = [1, 1]} : vector<4x128xf32> to vector<4x2xf32>
    %8 = vector.extract_strided_slice %4 {offsets = [0, 8], sizes = [4, 16], strides = [1, 1]} : vector<4x128xf32> to vector<4x16xf32>
    %c0_3 = arith.constant 0 : index
    %c0_4 = arith.constant 0 : index
    %9 = vector.load %arg5[%c0_3, %c0_4] : memref<144x128xbf16, #tpu.memory_space<vmem>>, vector<4x16xbf16>
    %c16 = arith.constant 16 : index
    %c0_5 = arith.constant 0 : index
    %10 = vector.load %arg5[%c16, %c0_5] : memref<144x128xbf16, #tpu.memory_space<vmem>>, vector<32x96xbf16>
    %c48 = arith.constant 48 : index
    %c0_6 = arith.constant 0 : index
    %11 = vector.load %arg5[%c48, %c0_6] : memref<144x128xbf16, #tpu.memory_space<vmem>>, vector<96x24xbf16>
    %c0_7 = arith.constant 0 : index
    %c0_8 = arith.constant 0 : index
    %12 = vector.load %arg6[%c0_7, %c0_8] : memref<40x128xf32, #tpu.memory_space<vmem>>, vector<4x16xf32>
    %c8 = arith.constant 8 : index
    %c0_9 = arith.constant 0 : index
    %13 = vector.load %arg6[%c8, %c0_9] : memref<40x128xf32, #tpu.memory_space<vmem>>, vector<4x128xf32>
    %c16_10 = arith.constant 16 : index
    %c0_11 = arith.constant 0 : index
    %14 = vector.load %arg6[%c16_10, %c0_11] : memref<40x128xf32, #tpu.memory_space<vmem>>, vector<4x32xf32>
    %c24 = arith.constant 24 : index
    %c0_12 = arith.constant 0 : index
    %15 = vector.load %arg6[%c24, %c0_12] : memref<40x128xf32, #tpu.memory_space<vmem>>, vector<4x96xf32>
    %c32 = arith.constant 32 : index
    %c0_13 = arith.constant 0 : index
    %16 = vector.load %arg6[%c32, %c0_13] : memref<40x128xf32, #tpu.memory_space<vmem>>, vector<4x24xf32>
    %17 = arith.truncf %5 : vector<4x4xf32> to vector<4x4xbf16>
    %cst = arith.constant dense<0.000000e+00> : vector<4x16xf32>
    %18 = tpu.matmul %17, %9, %cst {dimension_numbers = #tpu.dot_dimension_numbers<[1], [0], [0], [1], [0, 0, 1, 1], [], []>} : vector<4x4xbf16>, vector<4x16xbf16>, vector<4x16xf32> -> vector<4x16xf32>
    %19 = arith.addf %18, %12 : vector<4x16xf32>
    %cst_14 = arith.constant 0.000000e+00 : f32
    %20 = vector.broadcast %cst_14 : f32 to vector<4x16xf32>
    %21 = arith.cmpf ogt, %19, %20 : vector<4x16xf32>
    %cst_15 = arith.constant 0.00999999977 : f32
    %22 = vector.broadcast %cst_15 : f32 to vector<4x16xf32>
    %23 = arith.mulf %22, %19 : vector<4x16xf32>
    %24 = arith.select %21, %19, %23 : vector<4x16xi1>, vector<4x16xf32>
    %c0_16 = arith.constant 0 : index
    %c0_17 = arith.constant 0 : index
    %25 = vector.load %arg8[%c0_16, %c0_17] : memref<4x32xf32, #tpu.memory_space<vmem>>, vector<4x32xf32>
    %c0_18 = arith.constant 0 : index
    %c0_19 = arith.constant 0 : index
    %26 = vector.load %arg4[%c0_18, %c0_19] : memref<560x128xbf16, #tpu.memory_space<vmem>>, vector<16x128xbf16>
    %27 = arith.truncf %24 : vector<4x16xf32> to vector<4x16xbf16>
    %cst_20 = arith.constant dense<0.000000e+00> : vector<4x128xf32>
    %28 = tpu.matmul %27, %26, %cst_20 {dimension_numbers = #tpu.dot_dimension_numbers<[1], [0], [0], [1], [0, 0, 1, 1], [], []>} : vector<4x16xbf16>, vector<16x128xbf16>, vector<4x128xf32> -> vector<4x128xf32>
    %c0_21 = arith.constant 0 : index
    %c0_22 = arith.constant 0 : index
    %c0_23 = arith.constant 0 : index
    %29 = vector.load %arg3[%c0_21, %c0_22, %c0_23] : memref<1x4x512xbf16, #tpu.memory_space<vmem>>, vector<1x4x512xbf16>
    %30 = vector.shape_cast %29 : vector<1x4x512xbf16> to vector<4x512xbf16>
    %c16_24 = arith.constant 16 : index
    %c0_25 = arith.constant 0 : index
    %31 = vector.load %arg4[%c16_24, %c0_25] : memref<560x128xbf16, #tpu.memory_space<vmem>>, vector<512x128xbf16>
    %cst_26 = arith.constant dense<0.000000e+00> : vector<4x128xf32>
    %32 = tpu.matmul %30, %31, %cst_26 {dimension_numbers = #tpu.dot_dimension_numbers<[1], [0], [0], [1], [0, 0, 1, 1], [], []>} : vector<4x512xbf16>, vector<512x128xbf16>, vector<4x128xf32> -> vector<4x128xf32>
    %33 = arith.addf %28, %32 : vector<4x128xf32>
    %34 = arith.addf %33, %13 : vector<4x128xf32>
    %c528 = arith.constant 528 : index
    %c0_27 = arith.constant 0 : index
    %35 = vector.load %arg4[%c528, %c0_27] : memref<560x128xbf16, #tpu.memory_space<vmem>>, vector<32x128xbf16>
    %36 = arith.truncf %25 : vector<4x32xf32> to vector<4x32xbf16>
    %cst_28 = arith.constant dense<0.000000e+00> : vector<4x128xf32>
    %37 = tpu.matmul %36, %35, %cst_28 {dimension_numbers = #tpu.dot_dimension_numbers<[1], [0], [0], [1], [0, 0, 1, 1], [], []>} : vector<4x32xbf16>, vector<32x128xbf16>, vector<4x128xf32> -> vector<4x128xf32>
    %38 = vector.extract_strided_slice %34 {offsets = [0, 0], sizes = [4, 32], strides = [1, 1]} : vector<4x128xf32> to vector<4x32xf32>
    %39 = vector.extract_strided_slice %37 {offsets = [0, 0], sizes = [4, 32], strides = [1, 1]} : vector<4x128xf32> to vector<4x32xf32>
    %40 = arith.addf %38, %39 : vector<4x32xf32>
    %41 = arith.negf %40 : vector<4x32xf32>
    %42 = math.exp %41 : vector<4x32xf32>
    %cst_29 = arith.constant 1.000000e+00 : f32
    %43 = vector.broadcast %cst_29 : f32 to vector<4x32xf32>
    %44 = arith.addf %43, %42 : vector<4x32xf32>
    %45 = arith.divf %43, %44 : vector<4x32xf32>
    %46 = vector.extract_strided_slice %34 {offsets = [0, 32], sizes = [4, 32], strides = [1, 1]} : vector<4x128xf32> to vector<4x32xf32>
    %47 = vector.extract_strided_slice %37 {offsets = [0, 32], sizes = [4, 32], strides = [1, 1]} : vector<4x128xf32> to vector<4x32xf32>
    %48 = arith.addf %46, %47 : vector<4x32xf32>
    %49 = arith.negf %48 : vector<4x32xf32>
    %50 = math.exp %49 : vector<4x32xf32>
    %cst_30 = arith.constant 1.000000e+00 : f32
    %51 = vector.broadcast %cst_30 : f32 to vector<4x32xf32>
    %52 = arith.addf %51, %50 : vector<4x32xf32>
    %53 = arith.divf %51, %52 : vector<4x32xf32>
    %54 = vector.extract_strided_slice %34 {offsets = [0, 64], sizes = [4, 32], strides = [1, 1]} : vector<4x128xf32> to vector<4x32xf32>
    %55 = vector.extract_strided_slice %37 {offsets = [0, 64], sizes = [4, 32], strides = [1, 1]} : vector<4x128xf32> to vector<4x32xf32>
    %56 = arith.addf %55, %14 : vector<4x32xf32>
    %57 = arith.mulf %45, %56 : vector<4x32xf32>
    %58 = arith.addf %54, %57 : vector<4x32xf32>
    %59 = math.tanh %58 : vector<4x32xf32>
    %cst_31 = arith.constant 1.000000e+00 : f32
    %60 = vector.broadcast %cst_31 : f32 to vector<4x32xf32>
    %61 = arith.subf %60, %53 : vector<4x32xf32>
    %62 = arith.mulf %61, %59 : vector<4x32xf32>
    %63 = arith.mulf %53, %25 : vector<4x32xf32>
    %64 = arith.addf %62, %63 : vector<4x32xf32>
    %c0_32 = arith.constant 0 : index
    %c0_33 = arith.constant 0 : index
    %65 = vector.load %arg8[%c0_32, %c0_33] : memref<4x32xf32, #tpu.memory_space<vmem>>, vector<4x32xf32>
    tpu.vector_store %arg8[%c0_32, %c0_33], %64 {strides = array<i32>} : memref<4x32xf32, #tpu.memory_space<vmem>>, vector<4x32xf32>,
    %66 = arith.truncf %64 : vector<4x32xf32> to vector<4x32xbf16>
    %cst_34 = arith.constant dense<0.000000e+00> : vector<4x96xf32>
    %67 = tpu.matmul %66, %10, %cst_34 {dimension_numbers = #tpu.dot_dimension_numbers<[1], [0], [0], [1], [0, 0, 1, 1], [], []>} : vector<4x32xbf16>, vector<32x96xbf16>, vector<4x96xf32> -> vector<4x96xf32>
    %68 = arith.addf %67, %15 : vector<4x96xf32>
    %cst_35 = arith.constant 0.000000e+00 : f32
    %69 = vector.broadcast %cst_35 : f32 to vector<4x96xf32>
    %70 = arith.cmpf ogt, %68, %69 : vector<4x96xf32>
    %cst_36 = arith.constant 0.00999999977 : f32
    %71 = vector.broadcast %cst_36 : f32 to vector<4x96xf32>
    %72 = arith.mulf %71, %68 : vector<4x96xf32>
    %73 = arith.select %70, %68, %72 : vector<4x96xi1>, vector<4x96xf32>
    %74 = arith.truncf %73 : vector<4x96xf32> to vector<4x96xbf16>
    %cst_37 = arith.constant dense<0.000000e+00> : vector<4x24xf32>
    %75 = tpu.matmul %74, %11, %cst_37 {dimension_numbers = #tpu.dot_dimension_numbers<[1], [0], [0], [1], [0, 0, 1, 1], [], []>} : vector<4x96xbf16>, vector<96x24xbf16>, vector<4x24xf32> -> vector<4x24xf32>
    %76 = arith.addf %75, %16 : vector<4x24xf32>
    %77 = vector.extract_strided_slice %76 {offsets = [0, 0], sizes = [4, 2], strides = [1, 1]} : vector<4x24xf32> to vector<4x2xf32>
    %78 = vector.extract_strided_slice %76 {offsets = [0, 2], sizes = [4, 2], strides = [1, 1]} : vector<4x24xf32> to vector<4x2xf32>
    %79 = vector.extract_strided_slice %76 {offsets = [0, 4], sizes = [4, 2], strides = [1, 1]} : vector<4x24xf32> to vector<4x2xf32>
    %80 = vector.extract_strided_slice %76 {offsets = [0, 6], sizes = [4, 2], strides = [1, 1]} : vector<4x24xf32> to vector<4x2xf32>
    %81 = vector.extract_strided_slice %76 {offsets = [0, 8], sizes = [4, 16], strides = [1, 1]} : vector<4x24xf32> to vector<4x16xf32>
    %82 = math.exp %78 : vector<4x2xf32>
    %83 = arith.mulf %82, %6 : vector<4x2xf32>
    %84 = arith.addf %77, %83 : vector<4x2xf32>
    %cst_38 = arith.constant -5.000000e-01 : f32
    %85 = vector.broadcast %cst_38 : f32 to vector<4x2xf32>
    %86 = arith.mulf %85, %6 : vector<4x2xf32>
    %87 = arith.mulf %86, %6 : vector<4x2xf32>
    %88 = arith.subf %87, %78 : vector<4x2xf32>
    %cst_39 = arith.constant 0.918938517 : f32
    %89 = vector.broadcast %cst_39 : f32 to vector<4x2xf32>
    %90 = arith.subf %88, %89 : vector<4x2xf32>
    %91 = math.exp %80 : vector<4x2xf32>
    %92 = arith.mulf %91, %7 : vector<4x2xf32>
    %93 = arith.addf %79, %92 : vector<4x2xf32>
    %cst_40 = arith.constant -5.000000e-01 : f32
    %94 = vector.broadcast %cst_40 : f32 to vector<4x2xf32>
    %95 = arith.mulf %94, %7 : vector<4x2xf32>
    %96 = arith.mulf %95, %7 : vector<4x2xf32>
    %97 = arith.subf %96, %80 : vector<4x2xf32>
    %cst_41 = arith.constant 0.918938517 : f32
    %98 = vector.broadcast %cst_41 : f32 to vector<4x2xf32>
    %99 = arith.subf %97, %98 : vector<4x2xf32>
    %100 = arith.addf %81, %8 : vector<4x16xf32>
    %cst_42 = arith.constant dense<0xFF800000> : vector<4xf32>
    %101 = vector.multi_reduction <maximumf>, %100, %cst_42 [1] : vector<4x16xf32> to vector<4xf32>
    %102 = vector.shape_cast %101 : vector<4xf32> to vector<4x1xf32>
    %103 = tpu.iota {dimensions = array<i32: 1>} : vector<4x16xi32>
    %104 = vector.broadcast %102 : vector<4x1xf32> to vector<4x16xf32>
    %105 = arith.cmpf oge, %100, %104 : vector<4x16xf32>
    %c16_i32 = arith.constant 16 : i32
    %106 = vector.broadcast %c16_i32 : i32 to vector<4x16xi32>
    %107 = arith.select %105, %103, %106 : vector<4x16xi1>, vector<4x16xi32>
    %cst_43 = arith.constant dense<2147483647> : vector<4xi32>
    %108 = vector.multi_reduction <minsi>, %107, %cst_43 [1] : vector<4x16xi32> to vector<4xi32>
    %109 = vector.shape_cast %108 : vector<4xi32> to vector<4x1xi32>
    %110 = vector.broadcast %109 : vector<4x1xi32> to vector<4x16xi32>
    %111 = arith.cmpi eq, %103, %110 : vector<4x16xi32>
    %112 = arith.extui %111 : vector<4x16xi1> to vector<4x16xi32>
    %113 = arith.sitofp %112 : vector<4x16xi32> to vector<4x16xf32>
    %c0_44 = arith.constant 0 : index
    %c0_45 = arith.constant 0 : index
    %c0_46 = arith.constant 0 : index
    %114 = vector.load %arg7[%c0_44, %c0_45, %c0_46] : memref<1x4x128xf32, #tpu.memory_space<vmem>>, vector<1x4x2xf32>
    %115 = vector.shape_cast %114 : vector<1x4x2xf32> to vector<4x2xf32>
    %116 = vector.shape_cast %84 : vector<4x2xf32> to vector<1x4x2xf32>
    tpu.vector_store %arg7[%c0_44, %c0_45, %c0_46], %116 {strides = array<i32>} : memref<1x4x128xf32, #tpu.memory_space<vmem>>, vector<1x4x2xf32>,
    %c0_47 = arith.constant 0 : index
    %c0_48 = arith.constant 0 : index
    %c2 = arith.constant 2 : index
    %117 = vector.load %arg7[%c0_47, %c0_48, %c2] : memref<1x4x128xf32, #tpu.memory_space<vmem>>, vector<1x4x2xf32>
    %118 = vector.shape_cast %117 : vector<1x4x2xf32> to vector<4x2xf32>
    %119 = vector.shape_cast %90 : vector<4x2xf32> to vector<1x4x2xf32>
    tpu.vector_store %arg7[%c0_47, %c0_48, %c2], %119 {strides = array<i32>} : memref<1x4x128xf32, #tpu.memory_space<vmem>>, vector<1x4x2xf32>,
    %c0_49 = arith.constant 0 : index
    %c0_50 = arith.constant 0 : index
    %c4 = arith.constant 4 : index
    %120 = vector.load %arg7[%c0_49, %c0_50, %c4] : memref<1x4x128xf32, #tpu.memory_space<vmem>>, vector<1x4x2xf32>
    %121 = vector.shape_cast %120 : vector<1x4x2xf32> to vector<4x2xf32>
    %122 = vector.shape_cast %93 : vector<4x2xf32> to vector<1x4x2xf32>
    tpu.vector_store %arg7[%c0_49, %c0_50, %c4], %122 {strides = array<i32>} : memref<1x4x128xf32, #tpu.memory_space<vmem>>, vector<1x4x2xf32>,
    %c0_51 = arith.constant 0 : index
    %c0_52 = arith.constant 0 : index
    %c6 = arith.constant 6 : index
    %123 = vector.load %arg7[%c0_51, %c0_52, %c6] : memref<1x4x128xf32, #tpu.memory_space<vmem>>, vector<1x4x2xf32>
    %124 = vector.shape_cast %123 : vector<1x4x2xf32> to vector<4x2xf32>
    %125 = vector.shape_cast %99 : vector<4x2xf32> to vector<1x4x2xf32>
    tpu.vector_store %arg7[%c0_51, %c0_52, %c6], %125 {strides = array<i32>} : memref<1x4x128xf32, #tpu.memory_space<vmem>>, vector<1x4x2xf32>,
    %c0_53 = arith.constant 0 : index
    %c0_54 = arith.constant 0 : index
    %c8_55 = arith.constant 8 : index
    %126 = vector.load %arg7[%c0_53, %c0_54, %c8_55] : memref<1x4x128xf32, #tpu.memory_space<vmem>>, vector<1x4x16xf32>
    %127 = vector.shape_cast %126 : vector<1x4x16xf32> to vector<4x16xf32>
    %128 = vector.shape_cast %113 : vector<4x16xf32> to vector<1x4x16xf32>
    tpu.vector_store %arg7[%c0_53, %c0_54, %c8_55], %128 {strides = array<i32>} : memref<1x4x128xf32, #tpu.memory_space<vmem>>, vector<1x4x16xf32>,
    %c0_56 = arith.constant 0 : index
    %c0_57 = arith.constant 0 : index
    %c24_58 = arith.constant 24 : index
    %129 = vector.load %arg7[%c0_56, %c0_57, %c24_58] : memref<1x4x128xf32, #tpu.memory_space<vmem>>, vector<1x4x32xf32>
    %130 = vector.shape_cast %129 : vector<1x4x32xf32> to vector<4x32xf32>
    %131 = vector.shape_cast %64 : vector<4x32xf32> to vector<1x4x32xf32>
    tpu.vector_store %arg7[%c0_56, %c0_57, %c24_58], %131 {strides = array<i32>} : memref<1x4x128xf32, #tpu.memory_space<vmem>>, vector<1x4x32xf32>,
    return
  }
  func.func @transform_0(%arg0: i32) -> (i32, i32) {
    %c0_i32 = arith.constant 0 : i32
    %c0_i32_0 = arith.constant 0 : i32
    %c0_i32_1 = arith.constant 0 : i32
    return %c0_i32, %c0_i32_0 : i32, i32
  }
  func.func @transform_1(%arg0: i32) -> (i32, i32, i32) {
    %c0_i32 = arith.constant 0 : i32
    %c0_i32_0 = arith.constant 0 : i32
    %c0_i32_1 = arith.constant 0 : i32
    return %arg0, %c0_i32, %c0_i32_0 : i32, i32, i32
  }
  func.func @transform_2(%arg0: i32) -> (i32, i32, i32) {
    %c0_i32 = arith.constant 0 : i32
    %c0_i32_0 = arith.constant 0 : i32
    %c0_i32_1 = arith.constant 0 : i32
    return %arg0, %c0_i32, %c0_i32_0 : i32, i32, i32
  }
  func.func @transform_3(%arg0: i32) -> (i32, i32) {
    %c0_i32 = arith.constant 0 : i32
    %c0_i32_0 = arith.constant 0 : i32
    %c0_i32_1 = arith.constant 0 : i32
    return %c0_i32, %c0_i32_0 : i32, i32
  }
  func.func @transform_4(%arg0: i32) -> (i32, i32) {
    %c0_i32 = arith.constant 0 : i32
    %c0_i32_0 = arith.constant 0 : i32
    %c0_i32_1 = arith.constant 0 : i32
    return %c0_i32, %c0_i32_0 : i32, i32
  }
  func.func @transform_5(%arg0: i32) -> (i32, i32) {
    %c0_i32 = arith.constant 0 : i32
    %c0_i32_0 = arith.constant 0 : i32
    %c0_i32_1 = arith.constant 0 : i32
    return %c0_i32, %c0_i32_0 : i32, i32
  }
  func.func @transform_6(%arg0: i32) -> (i32, i32, i32) {
    %c0_i32 = arith.constant 0 : i32
    %c0_i32_0 = arith.constant 0 : i32
    %c0_i32_1 = arith.constant 0 : i32
    return %arg0, %c0_i32, %c0_i32_0 : i32, i32, i32
  }
}

</mosaic_0001>

<bundles_post_ra>
// kernel: action_processor_seq.1
= control target key start
LH: loop header
LB: loop body
LE: loop exit
PB: predicated region body
PF: predicated region fallthrough
CT: control target
= control target key end

     0   :  { %s2172_s0 = inlined_call_operand.hbm [shape: f32[4,32], index: 0, kind: input, shape index: {}]   ;;  %s2173_s1 = inlined_call_operand.hbm [shape: f32[8,4,128], index: 1, kind: input, shape index: {}]   ;;  %s2174_s2 = inlined_call_operand.hbm [shape: bf16[8,4,512], index: 2, kind: input, shape index: {}]   ;;  %s2175_s3 = inlined_call_operand.hbm [shape: bf16[560,128], index: 3, kind: input, shape index: {}]   ;;  %s2176_s4 = inlined_call_operand.hbm [shape: bf16[144,128], index: 4, kind: input, shape index: {}]   ;;  %s2177_s5 = inlined_call_operand.hbm [shape: f32[40,128], index: 5, kind: input, shape index: {}]   ;;  %s2178_s6 = inlined_call_operand.vmem [shape: f32[8,4,128], index: 6, kind: output, shape index: {}]  }
   0x1   :  { %2187 = sst [smem:[#allocation17_spill]] %s2172_s0 }
   0x2   :  { %2188 = sst [smem:[#allocation18_spill]] %s2173_s1 }
   0x3   :  { %11 = vsyncpa [#allocation4], 0 }
   0x4   :  { %12 = vsyncpa [#allocation6], 0 }
   0x5   :  { %14 = vsyncpa [#allocation6 + $0x1], 0 }
   0x6   :  { %15 = vsyncpa [#allocation9], 0 }
   0x7   :  { %16 = vsyncpa [#allocation12], 0  ;;  %s1901_s21 = smov 0   ;;  %s1903_s22 = smov 0  }
   0x8   :  { %s1905_s23 = smov 0   ;;  %s1907_s24 = smov 0  }
   0x9 LB: > { %s1846_s25 = smov [#allocation8]   ;;  %s1922_s27 = sadd.s32 4294967295, %s1844_s24   ;;  %s1844_s24 = sphi %s1907_s24, %s2214_s24   ;;  %s1840_s23 = sphi %s1905_s23, %s2213_s23   ;;  %s1836_s22 = sphi %s1903_s22, %s2212_s22   ;;  %s1832_s21 = sphi %s1901_s21, %s2211_s21  }
   0xa   : > { %s212_s26 = sshll.u32 %s1846_s25, 4  ;;  %p1307_p0 = scmp.ge.s32.totalorder %s1844_s24, 1  ;;  %s213_s26 = int_to_ptr.vmem [resolvable:$true] %s212_s26 }
   0xb   : > { %p2179_p1 = scmp.eq.s32.totalorder %s1922_s27, 0  ;;  %p189_p2 = scmp.lt.s32.totalorder %s1844_s24, 9 }
   0xc   : > { %s1941_s30 = sadd.s32 1, %s1844_s24   ;;  %s1649_s7 = scalar_lea.vmem %s213_s26, 4480 }
   0xd   : > { %p1928_p4 = pnand %p1307_p0, %p189_p2  ;;  %p1650_p8 = scmp.ne.s32.totalorder %s213_s26, %s1649_s7 }
   0xe   : > { %p1657_p11 = scmp.lt.s32.totalorder %s213_s26, %s213_s26  ;;  %p1658_p12 = scmp.lt.s32.totalorder %s1649_s7, %s1649_s7 }
   0xf   : > { %s2189_s28 = scalar_select %p1928_p4, 1, 0 }
  0x10   : > { %p1507_p5 = pneg %p1928_p4  ;;  %p1659_p13 = por %p1658_p12, %p1657_p11 }
  0x12   : > { %p1936_p6 = pnand %p1507_p5, %p2179_p1 }
  0x14   : > { %s2190_s29 = scalar_select %p1936_p6, 1, 0 }
  0x15   : > { %p2180_p7 = pneg %p1936_p6 }
  0x17   : > { %p1652_p9 = pnand %p1650_p8, %p2180_p7 }
  0x19   : > { %p1653_p10 = pneg %p1652_p9 }
  0x1b   : > { %p1660_p0 = pnand %p1659_p13, %p1653_p10 }
  0x1d   : > { %1663 = shalt.err (!%p1660_p0)
}
  0x1e   : > { %s2181_s8 = smov 64   ;;  %s1848_s9 = smov 4  }
  0x1f   : > { %1513 = dma.hbm_to_vmem [thread:$0]  (!%p1936_p6), %s2175_s3, 4480, %s213_s26, [#allocation9], %s2181_s8, %s2181_s8, %s1848_s9  }
  0x20   : > { %s47_s12 = ssub.s32 %s1844_s24, %s1941_s30  ;;  %s50_s13 = sadd.s32 1, %s1840_s23 }
  0x21   : > { %p48_p2 = scmp.eq.s32.totalorder %s47_s12, 0  ;;  %p57_p5 = scmp.ne.s32.totalorder %s1840_s23, %s1836_s22 }
  0x22   : > { %p58_p8 = scmp.eq.s32.totalorder %s1844_s24, 0  ;;  %p63_p9 = scmp.ne.s32.totalorder %s1836_s22, %s1832_s21 }
  0x23   : > { %s1965_s14 = scalar_select %p48_p2, %s1840_s23, %s50_s13  }
  0x24   : > { %p59_p10 = por %p58_p8, %p57_p5  ;;  %p1969_p11 = por %p2179_p1, %p63_p9 }
  0x25   : > { %p1531_p12 = scmp.lt.s32.totalorder %s1844_s24, 8  ;;  %s252_s16 = sand.u32 1, %s1844_s24  }
  0x26   : > { %s2191_s15 = scalar_select %p1969_p11, 1, 0 }
  0x27   : > { %s254_s17 = sand.u32 1, %s1840_s23   ;;  %s1314_s19 = sshll.u32 %s1844_s24, 6 }
  0x28   : > { %s1313_s18 = sshll.u32 %s254_s17, 2  ;;  %s2192_s1 = sld [smem:[#allocation18_spill]] }
  0x29   : > { %s256_s21 = scalar_lea.vmem [#allocation5], %s1313_s18  ;;  %p1982_p13 = pnand %p1531_p12, %p59_p10 }
  0x2a   : > { %s263_s7 = sshll.u32 %s256_s21, 4  ;;  %s1986_s11 = sshll.u32 %s254_s17, 3  ;;  %s264_s7 = int_to_ptr.vmem [resolvable:$true] %s263_s7 }
  0x2b   : > { %s1988_s12 = scalar_lea.sflag [#allocation6], %s252_s16  ;;  %p2186_p2 = pneg %p1982_p13 }
  0x2e   : > { %s1980_s26 = scalar_lea.hbm %s2192_s1, %s1314_s19  ;;  %s1669_s20 = scalar_lea.hbm %s2192_s1, 512 }
  0x2f   : > { %s1664_s13 = scalar_lea.hbm %s1980_s26, 64  ;;  %p1670_p9 = scmp.lt.s32.totalorder %s1980_s26, %s2192_s1 }
  0x30   : > { %p1665_p0 = scmp.ne.s32.totalorder %s1980_s26, %s1664_s13  ;;  %p1671_p10 = scmp.lt.s32.totalorder %s1669_s20, %s1664_s13 }
  0x32   : > { %p1667_p5 = pnand %p2186_p2, %p1665_p0  ;;  %p1672_p12 = por %p1671_p10, %p1670_p9 }
  0x34   : > { %p1668_p8 = pneg %p1667_p5 }
  0x36   : > { %p1673_p3 = pnand %p1672_p12, %p1668_p8 }
  0x38   : > { %1676 = shalt.err (!%p1673_p3)
}
  0x39   : > { %s1677_s16 = scalar_lea.vmem %s264_s7, 64  ;;  %s1849_s17 = smov [#allocation5]  }
  0x3a   : > { %p1678_p1 = scmp.ne.s32.totalorder %s264_s7, %s1677_s16  ;;  %s1682_s8 = sshll.u32 %s1849_s17, 4  ;;  %s1683_s8 = int_to_ptr.vmem [resolvable:$false] %s1682_s8 }
  0x3b   : > { %s1684_s18 = scalar_lea.vmem %s1683_s8, 128  ;;  %p1685_p5 = scmp.lt.s32.totalorder %s264_s7, %s1683_s8 }
  0x3c   : > { %p1680_p7 = pnand %p1678_p1, %p2186_p2  ;;  %p1686_p11 = scmp.lt.s32.totalorder %s1684_s18, %s1677_s16 }
  0x3e   : > { %p1681_p0 = pneg %p1680_p7  ;;  %p1687_p4 = por %p1686_p11, %p1685_p5 }
  0x40   : > { %p1688_p6 = pnand %p1687_p4, %p1681_p0 }
  0x42   : > { %1691 = shalt.err (!%p1688_p6)
}
  0x43   : > { %1523 = dma.hbm_to_vmem [thread:$0]  (!%p1982_p13), %s1980_s26, 64, %s264_s7, %s1988_s12  }
  0x44   : > { %s1850_s13 = smov [#allocation3]   ;;  %s1851_s20 = smov [#allocation10]  }
  0x45   : > { %s202_s19 = sshll.u32 %s1850_s13, 4  ;;  %s225_s25 = sshll.u32 %s1851_s20, 4  ;;  %s203_s19 = int_to_ptr.vmem [resolvable:$true] %s202_s19  ;;  %s226_s25 = int_to_ptr.vmem [resolvable:$true] %s225_s25 }
  0x46   : > { %s1703_s21 = scalar_lea.vmem %s203_s19, 64  ;;  %p2194_p3 = scmp.ne.s32.totalorder %s2190_s29, 0 }
  0x47   : > { %p1704_p1 = scmp.ne.s32.totalorder %s203_s19, %s1703_s21  ;;  %p1711_p11 = scmp.lt.s32.totalorder %s203_s19, %s203_s19 }
  0x48   : > { %p2195_p7 = pneg %p2194_p3  ;;  %p1712_p4 = scmp.lt.s32.totalorder %s1703_s21, %s1703_s21 }
  0x4a   : > { %p1706_p8 = pnand %p1704_p1, %p2195_p7  ;;  %p1713_p6 = por %p1712_p4, %p1711_p11 }
  0x4c   : > { %p1707_p9 = pneg %p1706_p8 }
  0x4e   : > { %p1714_p10 = pnand %p1713_p6, %p1707_p9 }
  0x50   : > { %1717 = shalt.err (!%p1714_p10)
}
  0x51   : > { %s2196_s0 = sld [smem:[#allocation17_spill]]  ;;  %s1729_s7 = scalar_lea.vmem %s226_s25, 1152 }
  0x52   : > { %p1730_p12 = scmp.ne.s32.totalorder %s226_s25, %s1729_s7  ;;  %p2197_p0 = pmov %p2195_p7 }
  0x53   : > { %p1737_p7 = scmp.lt.s32.totalorder %s226_s25, %s226_s25  ;;  %p1738_p8 = scmp.lt.s32.totalorder %s1729_s7, %s1729_s7 }
  0x54   : > { %p1732_p5 = pnand %p1730_p12, %p2197_p0 }
  0x55   : > { %p1739_p2 = por %p1738_p8, %p1737_p7 }
  0x56   : > { %p1733_p1 = pneg %p1732_p5 }
  0x57   : > { %1510 = dma.hbm_to_vmem [thread:$0]  (!%p2194_p3), %s2196_s0, 64, %s203_s19, [#allocation4]  }
  0x58   : > { %p1740_p11 = pnand %p1739_p2, %p1733_p1 }
  0x5a   : > { %1743 = shalt.err (!%p1740_p11)
}
  0x5b   : > { %s2198_s16 = smov 64   ;;  %s1852_s13 = smov [#allocation11]  }
  0x5c   : > { %1516 = dma.hbm_to_vmem [thread:$0]  (!%p2194_p3), %s2176_s4, 1152, %s226_s25, [#allocation9], %s2198_s16, %s2198_s16, %s1848_s9  }
  0x5d   : > { %s238_s19 = sshll.u32 %s1852_s13, 4  ;;  %p2199_p4 = pmov %p2197_p0  ;;  %s239_s19 = int_to_ptr.vmem [resolvable:$true] %s238_s19 }
  0x5e   : > { %s1755_s20 = scalar_lea.vmem %s239_s19, 640  ;;  %p1763_p10 = scmp.lt.s32.totalorder %s239_s19, %s239_s19 }
  0x5f   : > { %p1756_p9 = scmp.ne.s32.totalorder %s239_s19, %s1755_s20  ;;  %p1764_p12 = scmp.lt.s32.totalorder %s1755_s20, %s1755_s20 }
  0x61   : > { %p1758_p6 = pnand %p1756_p9, %p2199_p4  ;;  %p1765_p0 = por %p1764_p12, %p1763_p10 }
  0x63   : > { %p1759_p2 = pneg %p1758_p6 }
  0x65   : > { %p1766_p5 = pnand %p1765_p0, %p1759_p2 }
  0x67   : > { %1769 = shalt.err (!%p1766_p5)
}
  0x68   : > { %s1853_s21 = smov 128   ;;  %s1854_s9 = smov 8  }
  0x69   : > { %1519 = dma.hbm_to_vmem [thread:$0]  (!%p2194_p3), %s2177_s5, 640, %s239_s19, [#allocation12], %s1853_s21, %s1853_s21, %s1854_s9  }
  0x6a   : > { %s1381_s26 = sshll.u32 %s1844_s24, 7  ;;  %s274_s18 = scalar_lea.vmem [#allocation7], %s1986_s11 }
  0x6b   : > { %s280_s17 = scalar_lea.hbm %s2174_s2, %s1381_s26  ;;  %s282_s13 = sshll.u32 %s274_s18, 4  ;;  %s283_s13 = int_to_ptr.vmem [resolvable:$true] %s282_s13 }
  0x6c   : > { %s1770_s20 = scalar_lea.hbm %s280_s17, 128  ;;  %p2200_p7 = pneg %p1982_p13 }
  0x6d   : > { %p1771_p1 = scmp.ne.s32.totalorder %s280_s17, %s1770_s20  ;;  %s1775_s1 = scalar_lea.hbm %s2174_s2, 1024 }
  0x6e   : > { %p1776_p3 = scmp.lt.s32.totalorder %s280_s17, %s2174_s2  ;;  %p1777_p9 = scmp.lt.s32.totalorder %s1775_s1, %s1770_s20 }
  0x6f   : > { %p1773_p8 = pnand %p1771_p1, %p2200_p7 }
  0x70   : > { %p1778_p4 = por %p1777_p9, %p1776_p3 }
  0x71   : > { %p1774_p11 = pneg %p1773_p8 }
  0x73   : > { %p1779_p6 = pnand %p1778_p4, %p1774_p11 }
  0x75   : > { %1782 = shalt.err (!%p1779_p6)
}
  0x76   : > { %s1783_s24 = scalar_lea.vmem %s283_s13, 128  ;;  %p2201_p10 = pmov %p2200_p7 }
  0x77   : > { %p1784_p2 = scmp.ne.s32.totalorder %s283_s13, %s1783_s24  ;;  %s1855_s11 = smov [#allocation7]  }
  0x78   : > { %s1788_s21 = sshll.u32 %s1855_s11, 4  ;;  %s1789_s21 = int_to_ptr.vmem [resolvable:$false] %s1788_s21 }
  0x79   : > { %p1786_p12 = pnand %p1784_p2, %p2201_p10  ;;  %s1790_s0 = scalar_lea.vmem %s1789_s21, 256 }
  0x7a   : > { %p1791_p5 = scmp.lt.s32.totalorder %s283_s13, %s1789_s21  ;;  %p1792_p1 = scmp.lt.s32.totalorder %s1790_s0, %s1783_s24 }
  0x7b   : > { %p1787_p0 = pneg %p1786_p12 }
  0x7c   : > { %p1793_p7 = por %p1792_p1, %p1791_p5 }
  0x7e   : > { %p1794_p8 = pnand %p1793_p7, %p1787_p0 }
  0x80   : > { %1797 = shalt.err (!%p1794_p8)
}
  0x81   : > { %1526 = dma.hbm_to_vmem [thread:$0]  (!%p1982_p13), %s280_s17, 128, %s283_s13, %s1988_s12  }
  0x82   : > { %p2202_p11 = scmp.ne.s32.totalorder %s2189_s28, 0 }
  0x83   : > { %p2203_p3 = scmp.eq.s32.totalorder (!%p2202_p11), %s1922_s27, 0 }
  0x84   : > { %291 = sbr.rel (%p2202_p11) target bundleno = 2003 (0x7d3), region = 44 }
  0x89   : > { %1815 = dma.done.wait (%p2203_p3), [#allocation4], 64   ;;  %p2204_p9 = pmov %p2203_p3 }
  0x8a   : > { %s297_s1 = sand.u32 1, %s1922_s27   ;;  %s299_s9 = sand.u32 1, %s1836_s22  }
  0x8b   : > { %1817 = vsyncadd (%p2204_p9), [#allocation4], 4294967232  ;;  %s1320_s8 = sshll.u32 %s299_s9, 2  ;;  %s298_s26 = scalar_lea.sflag [#allocation6], %s297_s1 }
  0x8c   : > { %s301_s7 = scalar_lea.vmem [#allocation5], %s1320_s8  ;;  %p2205_p4 = scmp.ne.s32.totalorder %s2191_s15, 0 }
  0x8e   : > { %1819 = dma.done.wait (%p2205_p4), %s298_s26, 192  }
  0x8f   : > { %1821 = vsyncadd (%p2205_p4), %s298_s26, 4294967104  ;;  %s2070_s28 = sshll.u32 %s299_s9, 3  ;;  %p2206_p13 = pmov %p2203_p3 }
  0x90   : > { %s310_s10 = scalar_lea.vmem [#allocation7], %s2070_s28 }
  0x91   : > { %1823 = dma.done.wait (%p2206_p13), [#allocation9], 5632   ;;  %p2207_p6 = pmov %p2203_p3 }
  0x92   : > { %p2208_p2 = pmov %p2203_p3 }
  0x93   : > { %1825 = vsyncadd (%p2207_p6), [#allocation9], 4294961664 }
  0x94   : > { %1827 = dma.done.wait (%p2208_p2), [#allocation12], 640   ;;  %p2209_p10 = pmov %p2208_p2 }
  0x95   : > { %p355_p12 = scmp.lt.s32.totalorder %s1922_s27, 7  ;;  %p2210_p0 = scmp.ne.s32.totalorder %s1922_s27, 0 }
  0x96   : > { %1829 = vsyncadd (%p2209_p10), [#allocation12], 4294966656 }
  0x97   : > { %s356_s15 = scalar_select %p355_p12, %s1922_s27, 7 }
  0x98   : > { %363 = sbr.rel (%p2210_p0) target bundleno = 159 (0x9f), region = 72 }
  0x99   : > { %s1325_s12 = sshll.u32 %s356_s15, 2 }
  0x9a   : > { %s2086_s18 = scalar_lea.vmem %s2178_s6, %s1325_s12 }
  0x9d   : > { %v364_v0 = vld [vmem:[#allocation3] sm:$0xf]  ;;  %vm365_vm0 = vcmask 257024  }
  0x9e   : > { %366 = vst.msk [vmem:[#allocation2] sm:$0xf] %vm365_vm0, %v364_v0 }
  0x9f PF: > { %v368_v1 = vld [vmem:[#allocation10] sm:$0x3]  ;;  %vm395_vm1 = vcmask 1041408   ;;  %vm391_vm2 = vcmask 31744   ;;  %v1856_v2 = vmov 0.0   ;;  %vm1857_vm3 = vmmov 0  }
  0xa0   : > { %1443 = vmatprep.subr.bf16.mxu0 %v1856_v2  ;;  %v397_v3 = vsel %vm395_vm1, %v368_v1, 0  ;;  %1445 = vmatprep.mubr.msk.bf16.mxu0 %vm1857_vm3, %v1856_v2  ;;  %v2093_v4 = vld [vmem:[%s301_s7] sm:$0xf]  ;;  %v1586_v5 = vld [vmem:[#allocation8 + $0x80] sm:$0xff]   ;;  %v1588_v8 = vld [vmem:[#allocation8 + $0x78] sm:$0xff]   ;;  %v516_v33 = vlaneseq  ;;  %s1859_s27 = smov 64  }
  0xa1   : > { %1444 = vmatpush3.bf16.msra.mxu0 %v397_v3  ;;  %v390_v6 = vpack.c.bf16 %v2093_v4, %v2093_v4  ;;  %1384 = vmatprep.subr.bf16.mxu1 %v1586_v5  ;;  %v1587_v7 = vld [vmem:[#allocation8 + $0x40] sm:$0xff]   ;;  %v1590_v10 = vld [vmem:[#allocation8 + $0x38] sm:$0xff]   ;;  %v1592_v12 = vld [vmem:[#allocation8 + $0x70] sm:$0xff]   ;;  %v1858_v37 = vmov 1983009808   ;;  %vm811_vm5 = vcmask 130048  }
  0xa2   : > { %1385 = vmatpush3.bf16.msra.mxu1 %v1587_v7  ;;  %v1589_v9 = vld [vmem:[#allocation8 + $0x100] sm:$0xff]   ;;  %v1593_v13 = vld [vmem:[#allocation8 + $0xf8] sm:$0xff]   ;;  %v1594_v14 = vld [vmem:[#allocation8 + $0x30] sm:$0xff]   ;;  %v514_v38 = vunpack.c.l.s4 %v1858_v37  ;;  %v517_v39 = vshrl.u32 %v516_v33, 7  ;;  %vm873_vm6 = vcmask 261120   ;;  %s1860_s13 = smov 32  }
  0xa3   : > { %1386 = vmatprep.subr.bf16.mxu1 %v1588_v8  ;;  %1406 = vmatprep.subr.bf16.mxu0 %v1589_v9  ;;  %v1591_v11 = vld [vmem:[#allocation8 + $0xc0] sm:$0xff]   ;;  %v1595_v15 = vld [vmem:[#allocation8 + $0xb8] sm:$0xff]   ;;  %v1596_v16 = vld [vmem:[#allocation8 + $0x68] sm:$0xff]   ;;  %s1861_s20 = smov 96   ;;  %vm1057_vm8 = vcmask 785408   ;;  %s1862_s29 = smov 8  }
  0xa4   : > { %1446 = vmatmul.mubr.msk.bf16.vlgmr.msra.gmra.mxu0 %vm391_vm2, %v390_v6  ;;  %v1597_v17 = vld [vmem:[#allocation8 + $0xf0] sm:$0xff]   ;;  %v1598_v18 = vld [vmem:[#allocation8 + $0x28] sm:$0xff]   ;;  %v1600_v20 = vld [vmem:[#allocation8 + $0x60] sm:$0xff]   ;;  %v515_v44 = vunpack.c.0.s8 %v514_v38  ;;  %vm1130_vm9 = vcmask 191552   ;;  %s1863_s25 = smov 2   ;;  %s1864_s19 = smov 126  }
  0xa5   : > { %1407 = vmatpush3.bf16.msra.mxu0 %v1591_v11  ;;  %v1599_v19 = vld [vmem:[#allocation8 + $0xb0] sm:$0xff]   ;;  %v1601_v21 = vld [vmem:[#allocation8 + $0xe8] sm:$0xff]   ;;  %v1602_v22 = vld [vmem:[#allocation8 + $0x20] sm:$0xff]   ;;  %s1865_s24 = smov 120   ;;  %vm1158_vm13 = vcmask 11264   ;;  %vm1164_vm14 = vcmask 27664  }
  0xa6   : > { %1387 = vmatpush3.bf16.msra.mxu1 %v1590_v10  ;;  %1408 = vmatprep.subr.bf16.mxu0 %v1593_v13  ;;  %v1603_v23 = vld [vmem:[#allocation8 + $0xa8] sm:$0xff]   ;;  %v1604_v24 = vld [vmem:[#allocation8 + $0x58] sm:$0xff]   ;;  %v1605_v25 = vld [vmem:[#allocation8 + $0xe0] sm:$0xff]   ;;  %v518_v45 = vsub.s32 %v515_v44, %v517_v39  ;;  %vm1166_vm15 = vcmask 44064   ;;  %vm1168_vm0 = vcmask 60464   ;;  %vm1178_vm1 = vcmask 453824  }
  0xa7   : > { %1388 = vmatprep.subr.bf16.mxu1 %v1592_v12  ;;  %v1606_v26 = vld [vmem:[#allocation8 + $0x18] sm:$0xff]   ;;  %v1607_v27 = vld [vmem:[#allocation8 + $0xa0] sm:$0xff]   ;;  %v1608_v28 = vld [vmem:[#allocation8 + $0x50] sm:$0xff]   ;;  %vm956_vm2 = vcmask 257024  }
  0xa8   : > { %v1609_v29 = vld [vmem:[#allocation8 + $0xd8] sm:$0xff]   ;;  %v1610_v30 = vld [vmem:[#allocation8 + $0x10] sm:$0xff]   ;;  %v1612_v32 = vld [vmem:[#allocation8 + $0x48] sm:$0xff]  }
  0xa9   : > { %1409 = vmatpush3.bf16.msra.mxu0 %v1595_v15  ;;  %v1611_v31 = vld [vmem:[#allocation8 + $0x98] sm:$0xff]   ;;  %v1613_v34 = vld [vmem:[#allocation8 + $0xd0] sm:$0xff]   ;;  %v1614_v35 = vld [vmem:[#allocation8 + $0x8] sm:$0xff]  }
  0xaa   : > { %1389 = vmatpush3.bf16.msra.mxu1 %v1594_v14  ;;  %1410 = vmatprep.subr.bf16.mxu0 %v1597_v17  ;;  %v1615_v36 = vld [vmem:[#allocation8 + $0x90] sm:$0xff]   ;;  %v1617_v40 = vld [vmem:[#allocation8 + $0xc8] sm:$0xff]   ;;  %v1619_v50 = vld [vmem:[#allocation8] sm:$0xff]  }
  0xab   : > { %1390 = vmatprep.subr.bf16.mxu1 %v1596_v16  ;;  %v446_v41 = vld [vmem:[%s310_s10] sm:$0xff]  ;;  %v1618_v42 = vld [vmem:[#allocation8 + $0x88] sm:$0xff]   ;;  %v385_v52 = vld [vmem:[#allocation11] sm:$0xf] }
  0xac   : > { %v512_v43 = vcombine.high %v446_v41, %v446_v41  ;;  %v519_v46 = vrot.slane %v446_v41, %v518_v45  ;;  %v387_v51 = vld [vmem:[#allocation11 + $0x10] sm:$0xf]  ;;  %v1621_v62 = vld [vmem:[#allocation8 + $0x108] sm:$0xff]   ;;  %v442_v63 = vld [vmem:[#allocation2] sm:$0xf] }
  0xad   : > { %1411 = vmatpush3.bf16.msra.mxu0 %v1599_v19  ;;  %925 = vrot.lane.b32.xlu0 %v387_v51, %s1859_s27  ;;  %v1620_v59 = vld [vmem:[#allocation8 + $0x110] sm:$0xff]   ;;  %v860_v0 = vpack.c.bf16 %v442_v63, %v442_v63  ;;  %v1622_v37 = vld [vmem:[#allocation10 + $0x10] sm:$0xff]   ;;  %v1623_v38 = vld [vmem:[#allocation10 + $0x8] sm:$0xff]  }
  0xae   : > { %1391 = vmatpush3.bf16.msra.mxu1 %v1598_v18  ;;  %1412 = vmatprep.subr.bf16.mxu0 %v1601_v21  ;;  %v526_v47 = vrot.slane %v512_v43, %v518_v45  ;;  %v527_v48 = vcombine.high %v519_v46, %v519_v46  ;;  %v1625_v41 = vld [vmem:[#allocation10 + $0x38] sm:$0xff]   ;;  %v1626_v45 = vld [vmem:[#allocation10 + $0x30] sm:$0xff]  }
  0xaf   : > { %1392 = vmatprep.subr.bf16.mxu1 %v1600_v20 }
  0xb0   : > { %v528_v49 = vcombine.high %v526_v47, %v526_v47  ;;  %757 = vmatprep.mubr.bf16.mxu1 %v527_v48 }
  0xb1   : > { %1413 = vmatpush3.bf16.msra.mxu0 %v1603_v23 }
  0xb2   : > { %1393 = vmatpush3.bf16.msra.mxu1 %v1602_v22  ;;  %1414 = vmatprep.subr.bf16.mxu0 %v1605_v25  ;;  %v386_v25 = vld [vmem:[#allocation11 + $0x8] sm:$0xf] }
  0xb3   : > { %1394 = vmatprep.subr.bf16.mxu1 %v1604_v24  ;;  %797 = vmatprep.mubr.bf16.mxu0 %v528_v49  ;;  %v1627_v49 = vld [vmem:[#allocation10 + $0x28] sm:$0xff]  }
  0xb5   : > { %1415 = vmatpush3.bf16.msra.mxu0 %v1607_v27 }
  0xb6   : > { %1395 = vmatpush3.bf16.msra.mxu1 %v1606_v26  ;;  %1416 = vmatprep.subr.bf16.mxu0 %v1609_v29 }
  0xb7   : > { %1396 = vmatprep.subr.bf16.mxu1 %v1608_v28 }
  0xb9   : > { %1417 = vmatpush3.bf16.msra.mxu0 %v1611_v31 }
  0xba   : > { %1397 = vmatpush3.bf16.msra.mxu1 %v1610_v30  ;;  %1418 = vmatprep.subr.bf16.mxu0 %v1613_v34 }
  0xbb   : > { %1398 = vmatprep.subr.bf16.mxu1 %v1612_v32 }
  0xbd   : > { %1419 = vmatpush3.bf16.msra.mxu0 %v1615_v36 }
  0xbe   : > { %1399 = vmatpush3.bf16.msra.mxu1 %v1614_v35  ;;  %1420 = vmatprep.subr.bf16.mxu0 %v1617_v40  ;;  %v1624_v40 = vld [vmem:[#allocation10 + $0x40] sm:$0xff]  }
  0xbf   : > { %1449 = vmatprep.subr.bf16.mxu1 %v1856_v2 }
  0xc1   : > { %1421 = vmatpush3.bf16.msra.mxu0 %v1618_v42  ;;  %758 = vmatmul.mubr.bf16.vlgmr.msra.gmra.mxu1 %v519_v46 }
  0xc2   : > { %1471 = vmatprep.subr.bf16.mxu0 %v1856_v2  ;;  %1451 = vmatprep.mubr.msk.bf16.mxu1 %vm1857_vm3, %v1856_v2 }
  0xc3   : > { %1450 = vmatpush3.bf16.msra.mxu1 %v1619_v50 }
  0xc4   : > { %798 = vmatmul.mubr.bf16.vlgmr.msra.gmra.mxu0 %v526_v47  ;;  %1455 = vmatprep.subr.bf16.mxu1 %v1856_v2 }
  0xc5   : > { %1483 = vmatprep.mubr.msk.bf16.mxu0 %vm1857_vm3, %v1856_v2  ;;  %1472 = vmatpush3.bf16.msra.mxu0 %v1624_v40 }
  0xc6   : > { %1473 = vmatprep.subr.bf16.mxu0 %v1856_v2 }
  0xc9   : > { %1474 = vmatpush3.bf16.msra.mxu0 %v1625_v41 }
  0xca   : > { %1475 = vmatprep.subr.bf16.mxu0 %v1856_v2 }
  0xcd   : > { %1476 = vmatpush3.bf16.msra.mxu0 %v1626_v45 }
  0xce   : > { %1477 = vmatprep.subr.bf16.mxu0 %v1856_v2 }
  0xd1   : > { %1478 = vmatpush3.bf16.msra.mxu0 %v1627_v49 }
  0xd2   : > { %1479 = vmatprep.subr.bf16.mxu0 %v1856_v2 }
 0x11f   : > { %v926_v19 = vpop.permute.xlu0 %925 }
 0x164   : > { %v433_v53 = vpop.f32.mrf.mxu0 }
 0x165   : > { %v434_v54 = vadd.f32 %v433_v53, %v385_v52  ;;  %v1628_v52 = vld [vmem:[#allocation10 + $0x20] sm:$0xff]   ;;  %v1629_v53 = vld [vmem:[#allocation10 + $0x18] sm:$0xff]  }
 0x166   : > { %v1447_v55 = vpop.f32.mrf.mxu0  ;;  %1480 = vmatpush3.bf16.msra.mxu0 %v1628_v52 }
 0x167   : > { %vm439_vm4 = vcmp.gt.f32.partialorder %v434_v54, 0.0  ;;  %v440_v56 = vmul.f32 0.01, %v434_v54  ;;  %1481 = vmatprep.subr.bf16.mxu0 %v1856_v2 }
 0x168   : > { %v436_v57 = vpop.f32.mrf.mxu0 }
 0x169   : > { %v441_v58 = vsel %vm439_vm4, %v434_v54, %v440_v56  ;;  %v388_v54 = vld [vmem:[#allocation11 + $0x18] sm:$0xf] }
 0x16a   : > { %v445_v60 = vpack.c.bf16 %v441_v58, %v441_v58  ;;  %v1448_v61 = vpop.f32.mrf.mxu0  ;;  %1482 = vmatpush3.bf16.msra.mxu0 %v1629_v53 }
 0x16c   : > { %1452 = vmatmul.mubr.msk.bf16.vlgmr.msra.gmra.mxu1 %vm811_vm5, %v445_v60 }
 0x16d   : > { %1456 = vmatpush3.bf16.msra.mxu1 %v1620_v59  ;;  %1459 = vmatprep.mubr.msk.bf16.mxu1 %vm1857_vm3, %v1856_v2 }
 0x16e   : > { %1457 = vmatprep.subr.bf16.mxu1 %v1856_v2 }
 0x171   : > { %1458 = vmatpush3.bf16.msra.mxu1 %v1621_v62 }
 0x172   : > { %1463 = vmatprep.subr.bf16.mxu1 %v1856_v2 }
 0x174   : > { %1460 = vmatmul.mubr.msk.bf16.vlgmr.msra.gmra.mxu1 %vm873_vm6, %v860_v0  ;;  %v389_v0 = vld [vmem:[#allocation11 + $0x20] sm:$0xf] }
 0x175   : > { %1467 = vmatprep.mubr.msk.bf16.mxu1 %vm1857_vm3, %v1856_v2  ;;  %1464 = vmatpush3.bf16.msra.mxu1 %v1622_v37 }
 0x176   : > { %1465 = vmatprep.subr.bf16.mxu1 %v1856_v2 }
 0x179   : > { %1466 = vmatpush3.bf16.msra.mxu1 %v1623_v38 }
 0x181   : > { %v1400_v1 = vpop.f32.mrf.mxu1 }
 0x183   : > { %v1401_v5 = vpop.f32.mrf.mxu1 }
 0x184   : > { %v1422_v3 = vpop.f32.mrf.mxu0  ;;  %v1402_v7 = vadd.f32 %v1401_v5, %v1400_v1 }
 0x185   : > { %v1403_v9 = vpop.f32.mrf.mxu1 }
 0x186   : > { %v1423_v6 = vpop.f32.mrf.mxu0 }
 0x187   : > { %v1424_v8 = vadd.f32 %v1423_v6, %v1422_v3  ;;  %v1404_v12 = vpop.f32.mrf.mxu1 }
 0x188   : > { %v1425_v10 = vpop.f32.mrf.mxu0 }
 0x189   : > { %v800_v11 = vadd.f32 %v1424_v8, %v1402_v7 }
 0x18a   : > { %v1426_v13 = vpop.f32.mrf.mxu0 }
 0x22c   : > { %v849_v14 = vpop.f32.mrf.mxu1 }
 0x22d   : > { %v850_v15 = vadd.f32 %v849_v14, %v800_v11 }
 0x22e   : > { %v1453_v16 = vpop.f32.mrf.mxu1 }
 0x22f   : > { %v855_v26 = vadd.f32 %v850_v15, %v386_v25 }
 0x230   : > { %v852_v17 = vpop.f32.mrf.mxu1 }
 0x232   : > { %v1454_v18 = vpop.f32.mrf.mxu1 }
 0x234   : > { %v911_v20 = vpop.f32.mrf.mxu1 }
 0x235   : > { %v928_v21 = vadd.f32 %v926_v19, %v911_v20  ;;  %v917_v27 = vadd.f32 %v911_v20, %v855_v26 }
 0x236   : > { %v1461_v22 = vpop.f32.mrf.mxu1 }
 0x237   : > { %930 = vrot.lane.b32.xlu0 %v928_v21, %s1859_s27  ;;  %v1365_v28 = vmul.f32 -1.442695, %v917_v27 }
 0x238   : > { %v914_v23 = vpop.f32.mrf.mxu1 }
 0x239   : > { %1630 = vpow2.f32 %v1365_v28  ;;  %v1113_v23 = vmul.f32 -0.5, %v2093_v4 }
 0x23a   : > { %v1462_v24 = vpop.f32.mrf.mxu1 }
 0x23b   : > { %947 = vrot.lane.b32.xlu0 %v442_v63, %s1860_s13  ;;  %v1135_v63 = vand.u32 127, %v516_v33  ;;  %v1114_v28 = vmul.f32 %v1113_v23, %v2093_v4 }
 0x246   : > { %v1631_v29 = vpop.eup %1630 }
 0x247   : > { %v921_v30 = vadd.f32 1.0, %v1631_v29 }
 0x249   : > { %1632 = vrcp.f32 %v921_v30 }
 0x256   : > { %v1633_v31 = vpop.eup %1632 }
 0x257   : > { %v940_v43 = vsub.f32 1.0, %v1633_v31 }
 0x2a9   : > { %v931_v32 = vpop.permute.xlu0 %930 }
 0x2aa   : > { %v933_v34 = vmul.f32 %v1633_v31, %v931_v32 }
 0x2ac   : > { %935 = vrot.lane.b32.xlu1 %v933_v34, %s1859_s27 }
 0x2ad   : > { %v948_v42 = vpop.permute.xlu0 %947 }
 0x2ae   : > { %v950_v46 = vmul.f32 %v1633_v31, %v948_v42 }
 0x31e   : > { %v936_v35 = vpop.permute.xlu1 %935 }
 0x31f   : > { %v938_v36 = vadd.f32 %v936_v35, %v855_v26 }
 0x321   : > { %1634 = vtanh.f32 %v938_v36 }
 0x32e   : > { %v1635_v39 = vpop.eup %1634 }
 0x32f   : > { %942 = vrot.lane.b32.xlu1 %v1635_v39, %s1861_s20 }
 0x3a1   : > { %v943_v44 = vpop.permute.xlu1 %942 }
 0x3a2   : > { %v945_v47 = vmul.f32 %v943_v44, %v940_v43 }
 0x3a4   : > { %v2121_v48 = vadd.f32 %v950_v46, %v945_v47 }
 0x3a6   : > { %v958_v50 = vpack.c.bf16 %v2121_v48, %v2121_v48 }
 0x3a8   : > { %960 = vrot.lane.b32.xlu1 %v958_v50, %s1861_s20 }
 0x3ac   : > { %1137 = vrot.lane.b32.xlu1 %v1135_v63, %s1862_s29 }
 0x41a   : > { %v961_v51 = vpop.permute.xlu1 %960 }
 0x41b   : > { %1468 = vmatmul.mubr.msk.bf16.vlgmr.msra.gmra.mxu1 %vm873_vm6, %v961_v51 }
 0x41e   : > { %v1138_v10 = vpop.permute.xlu1 %1137 }
 0x4db   : > { %v1011_v55 = vpop.f32.mrf.mxu1 }
 0x4dc   : > { %v1012_v56 = vadd.f32 %v1011_v55, %v388_v54 }
 0x4dd   : > { %v1469_v57 = vpop.f32.mrf.mxu1 }
 0x4de   : > { %vm1017_vm7 = vcmp.gt.f32.partialorder %v1012_v56, 0.0  ;;  %v1018_v58 = vmul.f32 0.01, %v1012_v56 }
 0x4df   : > { %v1014_v59 = vpop.f32.mrf.mxu1 }
 0x4e0   : > { %v1019_v60 = vsel %vm1017_vm7, %v1012_v56, %v1018_v58 }
 0x4e1   : > { %v1020_v61 = vpack.c.bf16 %v1019_v60, %v1019_v60  ;;  %v1470_v62 = vpop.f32.mrf.mxu1 }
 0x4e3   : > { %1484 = vmatmul.mubr.msk.bf16.vlgmr.msra.gmra.mxu0 %vm1057_vm8, %v1020_v61 }
 0x5a3   : > { %v1095_v1 = vpop.f32.mrf.mxu0 }
 0x5a4   : > { %v2132_v3 = vadd.f32 %v1095_v1, %v389_v0 }
 0x5a5   : > { %v1485_v5 = vpop.f32.mrf.mxu0 }
 0x5a6   : > { %v1129_v6 = vadd.f32 %v2132_v3, %v2093_v4  ;;  %v1101_v15 = vmul.f32 1.442695, %v2132_v3  ;;  %v1127_v37 = vsub.f32 %v1114_v28, %v2132_v3 }
 0x5a7   : > { %v1098_v7 = vpop.f32.mrf.mxu0 }
 0x5a8   : > { %v1131_v8 = vsel %vm1130_vm9, %v1129_v6, -inf  ;;  %1636 = vpow2.f32 %v1101_v15  ;;  %v1377_v41 = vadd.f32 -0.9189385, %v1127_v37 }
 0x5a9   : > { %1132 = vmax.xlane.f32.xlu0 %v1131_v8  ;;  %v1486_v9 = vpop.f32.mrf.mxu0 }
 0x5b5   : > { %v1637_v16 = vpop.eup %1636 }
 0x5b6   : > { %v1121_v17 = vmul.f32 %v1637_v16, %v2093_v4 }
 0x632   : > { %v1133_v11 = vpop.xlane.xlu0 %1132 }
 0x633   : > { %vm1136_vm10 = vcmp.ge.f32.partialorder %v1129_v6, %v1133_v11 }
 0x634   : > { %v1139_v33 = vsel %vm1136_vm10, %v1138_v10, 16 }
 0x635   : > { %v1140_v12 = vsel %vm1130_vm9, %v1139_v33, 2147483647 }
 0x636   : > { %v1142_v13 = vshra.s32 %v1140_v12, 16  ;;  %v1141_v18 = vand.u32 65535, %v1140_v12 }
 0x638   : > { %v1144_v14 = vcvt.s32.f32 %v1142_v13  ;;  %v1143_v20 = vcvt.s32.f32 %v1141_v18 }
 0x63a   : > { %1145 = vmin.xlane.f32.xlu1 %v1144_v14 }
 0x64b   : > { %1116 = vrot.lane.b32.xlu1 %v2132_v3, %s1863_s25 }
 0x64f   : > { %1123 = vrot.lane.b32.xlu1 %v1121_v17, %s1864_s19 }
 0x6c3   : > { %v1146_v19 = vpop.xlane.xlu1 %1145 }
 0x6c4   : > { %vm1147_vm11 = vcmp.eq.f32.partialorder %v1144_v14, %v1146_v19  ;;  %v1152_v22 = vcvt.f32.s32 %v1146_v19 }
 0x6c5   : > { %v1148_v21 = vsel %vm1147_vm11, %v1143_v20, inf }
 0x6c6   : > { %1149 = vmin.xlane.f32.xlu0 %v1148_v21  ;;  %v1153_v25 = vshll.u32 %v1152_v22, 16 }
 0x6c7   : > { %v1117_v27 = vpop.permute.xlu1 %1116 }
 0x6c8   : > { %v1119_v31 = vsub.f32 %v1114_v28, %v1117_v27 }
 0x6ca   : > { %v1376_v35 = vadd.f32 -0.9189385, %v1119_v31 }
 0x6dc   : > { %1104 = vrot.lane.b32.xlu0 %v2093_v4, %s1864_s19  ;;  %v1124_v4 = vpop.permute.xlu1 %1123 }
 0x6dd   : > { %v1126_v39 = vadd.f32 %v1124_v4, %v2132_v3 }
 0x74f   : > { %v1150_v24 = vpop.xlane.xlu0 %1149 }
 0x750   : > { %v1151_v26 = vcvt.f32.s32 %v1150_v24 }
 0x752   : > { %v1154_v29 = vadd.s32 %v1153_v25, %v1151_v26 }
 0x753   : > { %v1105_v30 = vpop.permute.xlu0 %1104 }
 0x754   : > { %v1107_v32 = vmul.f32 %v1637_v16, %v1105_v30  ;;  %vm1155_vm12 = vcmp.eq.s32.totalorder %v1135_v63, %v1154_v29 }
 0x755   : > { %v1378_v34 = vsel %vm1155_vm12, 1.0, %v1856_v2 }
 0x756   : > { %1171 = vrot.lane.b32.xlu1 %v1378_v34, %s1862_s29  ;;  %1109 = vrot.lane.b32.xlu0 %v1107_v32, %s1864_s19 }
 0x75a   : > { %1175 = vrot.lane.b32.xlu1 %v2121_v48, %s1865_s24  ;;  %1161 = vrot.lane.b32.xlu0 %v1376_v35, %s1864_s19 }
 0x75e   : > { %953 = vrot.lane.b32.xlu0 %v2121_v48, %s1861_s20 }
 0x7c8   : > { %v1110_v36 = vpop.permute.xlu0 %1109  ;;  %v1172_v38 = vpop.permute.xlu1 %1171 }
 0x7c9   : > { %v1112_v2 = vadd.f32 %v1110_v36, %v2132_v3 }
 0x7cb   : > { %1159 = vst.msk [vmem:[%s2086_s18] sm:$0xf] %vm1158_vm13, %v1112_v2 }
 0x7cc   : > { %v1162_v40 = vpop.permute.xlu0 %1161  ;;  %v1176_v42 = vpop.permute.xlu1 %1175 }
 0x7cd   : > { %1165 = vst.msk [vmem:[%s2086_s18] sm:$0xf] %vm1164_vm14, %v1162_v40 }
 0x7ce   : > { %1167 = vst.msk [vmem:[%s2086_s18] sm:$0xf] %vm1166_vm15, %v1126_v39 }
 0x7cf   : > { %1169 = vst.msk [vmem:[%s2086_s18] sm:$0xf] %vm1168_vm0, %v1377_v41 }
 0x7d0   : > { %1174 = vst.msk [vmem:[%s2086_s18] sm:$0xf] %vm1130_vm9, %v1172_v38  ;;  %v954_v43 = vpop.permute.xlu0 %953 }
 0x7d1   : > { %1179 = vst.msk [vmem:[%s2086_s18] sm:$0xf] %vm1178_vm1, %v1176_v42 }
 0x7d2   : > { %957 = vst.msk [vmem:[#allocation2] sm:$0xf] %vm956_vm2, %v954_v43 }
 0x7d3 PF: > { %p19_p5 = scmp.ge.s32.totalorder %s1941_s30, 10   ;;  %s2211_s21 = smov %s1836_s22 }
 0x7d4   : > { %s2212_s22 = smov %s1840_s23  ;;  %s2213_s23 = smov %s1965_s14 }
 0x7d5   : > { %s2214_s24 = smov %s1941_s30  ;;  %21 = sbr.rel (!%p19_p5) target bundleno = 9 (0x9), region = 116 }
 0x7da   :  { %1199 = vsyncpa [#allocation4], 1 }
 0x7db   :  { %1201 = vsyncpa [#allocation4 + $0x1], 1 }
 0x7dc   :  { %1202 = vsyncpa [#allocation6], 1 }
 0x7dd   :  { %1204 = vsyncpa [#allocation6 + $0x1], 1 }
 0x7de   :  { %1205 = vsyncpa [#allocation9], 1 }
 0x7df   :  { %1206 = vsyncpa [#allocation12], 1 }

</bundles_post_ra>
